<compile_context>
chip_gen: v7x
topology: tpu7x:2x2x1
jax: 0.10.0
libtpu: 0.0.40
codegen_flags: <defaults>
</compile_context>

<pallas_src>
import functools
import math

import jax
import jax.numpy as jnp
from jax.experimental import pallas as pl
from jax.experimental.pallas import tpu as pltpu


def _dwconv_kernel(x_ref, halo_ref, w_ref, b_ref, o_ref, *, C, WC, G):
    # x_ref:    (1, TR, GWC)    grouped input rows of this tile (lane-dense)
    # halo_ref: (1, 1, 2, GWC)  [image row above tile, image row below tile];
    #                           "above" sits in the last WC lanes, "below" in
    #                           the first WC lanes; zeros at the image border.
    # w_ref:    (3, 3, GWC)     per-lane depthwise weights (border-masked)
    # b_ref:    (1, GWC)        per-lane bias
    # o_ref:    (1, TR, GWC)    output rows
    TR, GWC = x_ref.shape[1], x_ref.shape[2]
    f32 = jnp.float32

    xv = x_ref[0, :, :].astype(f32)                  # (TR, GWC)
    top = halo_ref[0, 0, 0:1, :].astype(f32)         # (1, GWC)
    bot = halo_ref[0, 0, 1:2, :].astype(f32)         # (1, GWC)
    w = w_ref[...].astype(f32)                       # (3, 3, GWC)
    b = b_ref[0, :].astype(f32)                      # (GWC,)

    # "up"/"dn": the value shifted by one *image* row (not one grouped row).
    if G == 1:
        if TR > 1:
            up = jnp.concatenate([top, xv[:-1, :]], axis=0)
            dn = jnp.concatenate([xv[1:, :], bot], axis=0)
        else:
            up, dn = top, bot
    else:
        seg = GWC - WC
        if TR > 1:
            up_wrap = jnp.concatenate([top[:, seg:], xv[:-1, seg:]], axis=0)
            dn_wrap = jnp.concatenate([xv[1:, :WC], bot[:, :WC]], axis=0)
        else:
            up_wrap, dn_wrap = top[:, seg:], bot[:, :WC]
        up = jnp.concatenate([up_wrap, xv[:, :seg]], axis=1)
        dn = jnp.concatenate([xv[:, WC:], dn_wrap], axis=1)

    # Row-mixed partial sums (kh = 0/1/2).  Each temporary is written and read
    # exactly once -- no per-tap accumulator round-trips.
    c_mid = up * w[0, 1] + xv * w[1, 1] + dn * w[2, 1]
    c_left = up * w[0, 0] + xv * w[1, 0] + dn * w[2, 0]    # kw = 0 taps
    c_right = up * w[0, 2] + xv * w[1, 2] + dn * w[2, 2]   # kw = 2 taps

    # Column shift by one pixel (= C lanes).  Border zeroing is already folded
    # into w[:, 0] / w[:, 2] in the wrapper, so plain zero-fill shifts suffice.
    zcol = jnp.zeros((TR, C), dtype=f32)
    from_left = jnp.concatenate([zcol, c_left[:, :GWC - C]], axis=1)
    from_right = jnp.concatenate([c_right[:, C:], zcol], axis=1)

    out = (c_mid + from_left) + (from_right + b)
    o_ref[0, ...] = out.astype(o_ref.dtype)


def _choose_layout(B, H, W, C, itemsize, target_block_bytes=1 << 20):
    """Pick row-grouping G (lane axis = G*W*C, multiple of 128) and row tile."""
    WC = W * C
    if WC % 128 == 0:
        G = 1
    else:
        G = 128 // math.gcd(WC, 128)
        if G > H or H % G != 0:
            # TODO(synk): could zero-pad rows to enable grouping here as well;
            # fall back to the ungrouped (possibly masked-store) layout.
            G = 1
    GWC = G * WC
    HG = H // G                                   # grouped rows (exact)

    cap_rows = max(8, target_block_bytes // (GWC * itemsize))
    cap_rows = max(8, (cap_rows // 8) * 8)

    def _tile_for(rows):                          # rows is a multiple of 8
        divs = [t for t in range(8, rows + 1, 8) if rows % t == 0]
        tr = max([t for t in divs if t <= cap_rows], default=8)
        # Guarantee >= 2 grid steps when B == 1 (v7x has 2 TensorCores).
        if B == 1 and rows // tr < 2:
            smaller = [t for t in divs if t <= rows // 2]
            if smaller:
                tr = max(smaller)
        return tr

    if HG % 8 == 0:
        HGp = HG
        TR = _tile_for(HGp)
    elif HG <= cap_rows and not (B == 1 and HG >= 16):
        HGp = HG                                  # single whole-extent block
        TR = HG
    else:
        HGp = ((HG + 7) // 8) * 8                 # zero-pad rows; sliced later
        TR = _tile_for(HGp)
    return G, GWC, WC, HGp, TR


def dwconv_pallas(x, weight, bias, H, W):
    """Depthwise 3x3 conv, stride 1, pad 1, groups=C, with bias.

    x: (B, N, C), N == H*W.  weight: (C, 1, 3, 3) (PyTorch layout).  bias: (C,).
    Returns (B, N, C).
    """
    B, N, C = x.shape
    assert N == H * W, "N must equal H*W"

    G, GWC, WC, HGp, TR = _choose_layout(B, H, W, C, x.dtype.itemsize)
    Hp = HGp * G
    TH_img = TR * G                               # image rows per grid step
    nT = HGp // TR

    # (B, H*W, C) -> (B, H, W*C): pure row-major view, no HBM copy.
    xr = x.reshape(B, H, WC)
    if Hp > H:                                    # zero rows == border padding
        xr = jnp.concatenate(
            [xr, jnp.zeros((B, Hp - H, WC), dtype=x.dtype)], axis=1)
    xg = xr.reshape(B, HGp, GWC)                  # grouped, lane-dense view

    # Per-tile halo rows: tile i needs image rows i*TH_img-1 and (i+1)*TH_img
    # (zeros at the image border).  Only 2 rows per tile instead of a padded
    # copy of the image in HBM.
    zero_row = jnp.zeros((B, 1, WC), dtype=x.dtype)
    if nT > 1:
        tops = xr[:, TH_img - 1::TH_img, :][:, :nT - 1, :]
        bots = xr[:, TH_img::TH_img, :][:, :nT - 1, :]
        top_halo = jnp.concatenate([zero_row, tops], axis=1)
        bot_halo = jnp.concatenate([bots, zero_row], axis=1)
    else:
        top_halo, bot_halo = zero_row, zero_row
    if G > 1:
        lane_pad = jnp.zeros((B, nT, GWC - WC), dtype=x.dtype)
        top_halo = jnp.concatenate([lane_pad, top_halo], axis=-1)  # last WC lanes
        bot_halo = jnp.concatenate([bot_halo, lane_pad], axis=-1)  # first WC lanes
    halo = jnp.stack([top_halo, bot_halo], axis=2)                 # (B, nT, 2, GWC)

    # weight (C,1,3,3) -> (kh,kw,C) -> lane-tiled (3,3,GWC).  Fold the image
    # left/right border zeroing into the kw=0 / kw=2 weight lanes so the kernel
    # needs no border masks at all.
    w = jnp.transpose(weight[:, 0, :, :], (1, 2, 0)).astype(jnp.float32)
    w_t = jnp.tile(w, (1, 1, G * W))                               # (3, 3, GWC)
    col = jnp.arange(GWC) % WC
    w_t = w_t.at[:, 0, :].multiply((col < WC - C).astype(w_t.dtype))
    w_t = w_t.at[:, 2, :].multiply((col >= C).astype(w_t.dtype))
    b_t = jnp.tile(bias.reshape(1, C).astype(jnp.float32), (1, G * W))

    # VMEM budget: double-buffered in/out blocks + the handful of f32
    # temporaries the kernel body materializes; capped well below v7x's 64 MiB.
    block_bytes = TR * GWC * x.dtype.itemsize
    block_f32 = TR * GWC * 4
    need = 2 * 2 * block_bytes + 10 * block_f32 + 16 * GWC * 4 + (2 << 20)
    vmem_limit = int(min(48 * 2**20, max(16 * 2**20, need)))

    out = pl.pallas_call(
        functools.partial(_dwconv_kernel, C=C, WC=WC, G=G),
        out_shape=jax.ShapeDtypeStruct((B, HGp, GWC), x.dtype),
        grid_spec=pltpu.PrefetchScalarGridSpec(
            num_scalar_prefetch=0,
            grid=(B, nT),
            in_specs=[
                pl.BlockSpec((1, TR, GWC), lambda b, i: (b, i, 0)),
                pl.BlockSpec((1, 1, 2, GWC), lambda b, i: (b, i, 0, 0)),
                pl.BlockSpec((3, 3, GWC), lambda b, i: (0, 0, 0)),
                pl.BlockSpec((1, GWC), lambda b, i: (0, 0)),
            ],
            out_specs=pl.BlockSpec((1, TR, GWC), lambda b, i: (b, i, 0)),
        ),
        compiler_params=pltpu.CompilerParams(
            dimension_semantics=("parallel", "parallel"),
            vmem_limit_bytes=vmem_limit,
        ),
        # NOTE(review, v5e): pl.Buffered(3) on the x/out specs only pays off if
        # per-step DMA is still exposed after these changes; left at default 2.
    )(xg, halo, w_t, b_t)

    y = out.reshape(B, Hp, WC)
    if Hp > H:
        y = y[:, :H, :]
    return y.reshape(B, N, C)


def _reference(x, weight, bias, H, W):
    B, N, C = x.shape
    x_nchw = jnp.transpose(x.reshape(B, H, W, C), (0, 3, 1, 2))
    y = jax.lax.conv_general_dilated(
        x_nchw, weight, window_strides=(1, 1), padding=((1, 1), (1, 1)),
        feature_group_count=C,
        dimension_numbers=("NCHW", "OIHW", "NCHW")) + bias[None, :, None, None]
    return jnp.transpose(y.reshape(B, C, H * W), (0, 2, 1))


if __name__ == "__main__":
    key = jax.random.PRNGKey(0)

    def _run_case(case_key, B, C, H, W):
        k1, k2, k3 = jax.random.split(case_key, 3)
        x = jax.random.normal(k1, (B, H * W, C), dtype=jnp.float32)
        weight = jax.random.normal(k2, (C, 1, 3, 3), dtype=jnp.float32) * 0.1
        bias = jax.random.normal(k3, (C,), dtype=jnp.float32) * 0.1
        out = dwconv_pallas(x, weight, bias, H, W)
        jax.block_until_ready(out)
        ref = _reference(x, weight, bias, H, W)
        assert jnp.allclose(out, ref, atol=1e-4, rtol=1e-4), (
            f"mismatch vs reference for B={B} C={C} H={H} W={W}")

    keys = jax.random.split(key, 3)
    # Shapes implied by the module (B=2, C=4, 16x16 spatial): grouped lanes
    # (G=2 -> 128 lanes), one row tile per batch image, grid (2, 1).
    _run_case(keys[0], B=2, C=4, H=16, W=16)
    # Ungrouped lane-dense path (W*C = 128) with 2 row tiles when B == 1.
    _run_case(keys[1], B=1, C=8, H=32, W=16)
    # Grouped path (G=2) with cross-tile halo rows (2 row tiles).
    _run_case(keys[2], B=1, C=4, H=32, W=16)

    print("KERNEL_OK")
</pallas_src>

<mosaic_0001>
module attributes {stable_mosaic.version = 11 : i64} {
  func.func @_dwconv_kernel(%arg0: i32, %arg1: i32, %arg2: memref<1x8x128xf32, #tpu.memory_space<vmem>>, %arg3: memref<1x1x2x128xf32, #tpu.memory_space<vmem>>, %arg4: memref<3x3x128xf32, #tpu.memory_space<vmem>>, %arg5: memref<1x128xf32, #tpu.memory_space<vmem>>, %arg6: memref<1x8x128xf32, #tpu.memory_space<vmem>>) attributes {dimension_semantics = [#tpu.dimension_semantics<parallel>, #tpu.dimension_semantics<parallel>], iteration_bounds = array<i64: 2, 1>, scalar_prefetch = 0 : i64, scratch_operands = 0 : i64, tpu.core_type = #tpu.core_type<tc>, window_params = [{transform_indices = @transform_0, window_bounds = array<i64: 1, 8, 128>}, {transform_indices = @transform_1, window_bounds = array<i64: 1, 1, 2, 128>}, {pipeline_mode = #tpu.pipeline_mode<synchronous>, transform_indices = @transform_2, window_bounds = array<i64: 3, 3, 128>}, {pipeline_mode = #tpu.pipeline_mode<synchronous>, transform_indices = @transform_3, window_bounds = array<i64: 1, 128>}, {transform_indices = @transform_4, window_bounds = array<i64: 1, 8, 128>}]} {
    %c0 = arith.constant 0 : index
    %c0_0 = arith.constant 0 : index
    %c0_1 = arith.constant 0 : index
    %0 = vector.load %arg2[%c0, %c0_0, %c0_1] : memref<1x8x128xf32, #tpu.memory_space<vmem>>, vector<1x8x128xf32>
    %1 = vector.shape_cast %0 : vector<1x8x128xf32> to vector<8x128xf32>
    %c0_2 = arith.constant 0 : index
    %c0_3 = arith.constant 0 : index
    %c0_4 = arith.constant 0 : index
    %c0_5 = arith.constant 0 : index
    %2 = vector.load %arg3[%c0_2, %c0_3, %c0_4, %c0_5] : memref<1x1x2x128xf32, #tpu.memory_space<vmem>>, vector<1x1x1x128xf32>
    %3 = vector.shape_cast %2 : vector<1x1x1x128xf32> to vector<1x128xf32>
    %c0_6 = arith.constant 0 : index
    %c0_7 = arith.constant 0 : index
    %c1 = arith.constant 1 : index
    %c0_8 = arith.constant 0 : index
    %4 = vector.load %arg3[%c0_6, %c0_7, %c1, %c0_8] : memref<1x1x2x128xf32, #tpu.memory_space<vmem>>, vector<1x1x1x128xf32>
    %5 = vector.shape_cast %4 : vector<1x1x1x128xf32> to vector<1x128xf32>
    %c0_9 = arith.constant 0 : index
    %c0_10 = arith.constant 0 : index
    %c0_11 = arith.constant 0 : index
    %6 = vector.load %arg4[%c0_9, %c0_10, %c0_11] : memref<3x3x128xf32, #tpu.memory_space<vmem>>, vector<3x3x128xf32>
    %c0_12 = arith.constant 0 : index
    %c0_13 = arith.constant 0 : index
    %7 = vector.load %arg5[%c0_12, %c0_13] : memref<1x128xf32, #tpu.memory_space<vmem>>, vector<1x128xf32>
    %8 = vector.shape_cast %7 : vector<1x128xf32> to vector<128xf32>
    %9 = vector.extract_strided_slice %3 {offsets = [0, 64], sizes = [1, 64], strides = [1, 1]} : vector<1x128xf32> to vector<1x64xf32>
    %10 = vector.extract_strided_slice %1 {offsets = [0, 64], sizes = [7, 64], strides = [1, 1]} : vector<8x128xf32> to vector<7x64xf32>
    %11 = tpu.concatenate %9, %10 in 0 : vector<1x64xf32>, vector<7x64xf32> -> vector<8x64xf32>
    %12 = vector.extract_strided_slice %1 {offsets = [1, 0], sizes = [7, 64], strides = [1, 1]} : vector<8x128xf32> to vector<7x64xf32>
    %13 = vector.extract_strided_slice %5 {offsets = [0, 0], sizes = [1, 64], strides = [1, 1]} : vector<1x128xf32> to vector<1x64xf32>
    %14 = tpu.concatenate %12, %13 in 0 : vector<7x64xf32>, vector<1x64xf32> -> vector<8x64xf32>
    %15 = vector.extract_strided_slice %1 {offsets = [0, 0], sizes = [8, 64], strides = [1, 1]} : vector<8x128xf32> to vector<8x64xf32>
    %16 = tpu.concatenate %11, %15 in 1 : vector<8x64xf32>, vector<8x64xf32> -> vector<8x128xf32>
    %17 = vector.extract_strided_slice %1 {offsets = [0, 64], sizes = [8, 64], strides = [1, 1]} : vector<8x128xf32> to vector<8x64xf32>
    %18 = tpu.concatenate %17, %14 in 1 : vector<8x64xf32>, vector<8x64xf32> -> vector<8x128xf32>
    %19 = vector.extract_strided_slice %6 {offsets = [0, 1, 0], sizes = [1, 1, 128], strides = [1, 1, 1]} : vector<3x3x128xf32> to vector<1x1x128xf32>
    %20 = vector.shape_cast %19 : vector<1x1x128xf32> to vector<128xf32>
    %21 = vector.shape_cast %20 : vector<128xf32> to vector<1x128xf32>
    %22 = vector.broadcast %21 : vector<1x128xf32> to vector<8x128xf32>
    %23 = arith.mulf %16, %22 : vector<8x128xf32>
    %24 = vector.extract_strided_slice %6 {offsets = [1, 1, 0], sizes = [1, 1, 128], strides = [1, 1, 1]} : vector<3x3x128xf32> to vector<1x1x128xf32>
    %25 = vector.shape_cast %24 : vector<1x1x128xf32> to vector<128xf32>
    %26 = vector.shape_cast %25 : vector<128xf32> to vector<1x128xf32>
    %27 = vector.broadcast %26 : vector<1x128xf32> to vector<8x128xf32>
    %28 = arith.mulf %1, %27 : vector<8x128xf32>
    %29 = arith.addf %23, %28 : vector<8x128xf32>
    %30 = vector.extract_strided_slice %6 {offsets = [2, 1, 0], sizes = [1, 1, 128], strides = [1, 1, 1]} : vector<3x3x128xf32> to vector<1x1x128xf32>
    %31 = vector.shape_cast %30 : vector<1x1x128xf32> to vector<128xf32>
    %32 = vector.shape_cast %31 : vector<128xf32> to vector<1x128xf32>
    %33 = vector.broadcast %32 : vector<1x128xf32> to vector<8x128xf32>
    %34 = arith.mulf %18, %33 : vector<8x128xf32>
    %35 = arith.addf %29, %34 : vector<8x128xf32>
    %36 = vector.extract_strided_slice %6 {offsets = [0, 0, 0], sizes = [1, 1, 128], strides = [1, 1, 1]} : vector<3x3x128xf32> to vector<1x1x128xf32>
    %37 = vector.shape_cast %36 : vector<1x1x128xf32> to vector<128xf32>
    %38 = vector.shape_cast %37 : vector<128xf32> to vector<1x128xf32>
    %39 = vector.broadcast %38 : vector<1x128xf32> to vector<8x128xf32>
    %40 = arith.mulf %16, %39 : vector<8x128xf32>
    %41 = vector.extract_strided_slice %6 {offsets = [1, 0, 0], sizes = [1, 1, 128], strides = [1, 1, 1]} : vector<3x3x128xf32> to vector<1x1x128xf32>
    %42 = vector.shape_cast %41 : vector<1x1x128xf32> to vector<128xf32>
    %43 = vector.shape_cast %42 : vector<128xf32> to vector<1x128xf32>
    %44 = vector.broadcast %43 : vector<1x128xf32> to vector<8x128xf32>
    %45 = arith.mulf %1, %44 : vector<8x128xf32>
    %46 = arith.addf %40, %45 : vector<8x128xf32>
    %47 = vector.extract_strided_slice %6 {offsets = [2, 0, 0], sizes = [1, 1, 128], strides = [1, 1, 1]} : vector<3x3x128xf32> to vector<1x1x128xf32>
    %48 = vector.shape_cast %47 : vector<1x1x128xf32> to vector<128xf32>
    %49 = vector.shape_cast %48 : vector<128xf32> to vector<1x128xf32>
    %50 = vector.broadcast %49 : vector<1x128xf32> to vector<8x128xf32>
    %51 = arith.mulf %18, %50 : vector<8x128xf32>
    %52 = arith.addf %46, %51 : vector<8x128xf32>
    %53 = vector.extract_strided_slice %6 {offsets = [0, 2, 0], sizes = [1, 1, 128], strides = [1, 1, 1]} : vector<3x3x128xf32> to vector<1x1x128xf32>
    %54 = vector.shape_cast %53 : vector<1x1x128xf32> to vector<128xf32>
    %55 = vector.shape_cast %54 : vector<128xf32> to vector<1x128xf32>
    %56 = vector.broadcast %55 : vector<1x128xf32> to vector<8x128xf32>
    %57 = arith.mulf %16, %56 : vector<8x128xf32>
    %58 = vector.extract_strided_slice %6 {offsets = [1, 2, 0], sizes = [1, 1, 128], strides = [1, 1, 1]} : vector<3x3x128xf32> to vector<1x1x128xf32>
    %59 = vector.shape_cast %58 : vector<1x1x128xf32> to vector<128xf32>
    %60 = vector.shape_cast %59 : vector<128xf32> to vector<1x128xf32>
    %61 = vector.broadcast %60 : vector<1x128xf32> to vector<8x128xf32>
    %62 = arith.mulf %1, %61 : vector<8x128xf32>
    %63 = arith.addf %57, %62 : vector<8x128xf32>
    %64 = vector.extract_strided_slice %6 {offsets = [2, 2, 0], sizes = [1, 1, 128], strides = [1, 1, 1]} : vector<3x3x128xf32> to vector<1x1x128xf32>
    %65 = vector.shape_cast %64 : vector<1x1x128xf32> to vector<128xf32>
    %66 = vector.shape_cast %65 : vector<128xf32> to vector<1x128xf32>
    %67 = vector.broadcast %66 : vector<1x128xf32> to vector<8x128xf32>
    %68 = arith.mulf %18, %67 : vector<8x128xf32>
    %69 = arith.addf %63, %68 : vector<8x128xf32>
    %cst = arith.constant 0.000000e+00 : f32
    %70 = vector.broadcast %cst : f32 to vector<8x4xf32>
    %71 = vector.extract_strided_slice %52 {offsets = [0, 0], sizes = [8, 124], strides = [1, 1]} : vector<8x128xf32> to vector<8x124xf32>
    %72 = tpu.concatenate %70, %71 in 1 : vector<8x4xf32>, vector<8x124xf32> -> vector<8x128xf32>
    %73 = vector.extract_strided_slice %69 {offsets = [0, 4], sizes = [8, 124], strides = [1, 1]} : vector<8x128xf32> to vector<8x124xf32>
    %74 = tpu.concatenate %73, %70 in 1 : vector<8x124xf32>, vector<8x4xf32> -> vector<8x128xf32>
    %75 = arith.addf %35, %72 : vector<8x128xf32>
    %76 = vector.shape_cast %8 : vector<128xf32> to vector<1x128xf32>
    %77 = vector.broadcast %76 : vector<1x128xf32> to vector<8x128xf32>
    %78 = arith.addf %74, %77 : vector<8x128xf32>
    %79 = arith.addf %75, %78 : vector<8x128xf32>
    %c0_14 = arith.constant 0 : index
    %c0_15 = arith.constant 0 : index
    %c0_16 = arith.constant 0 : index
    %80 = vector.load %arg6[%c0_14, %c0_15, %c0_16] : memref<1x8x128xf32, #tpu.memory_space<vmem>>, vector<1x8x128xf32>
    %81 = vector.shape_cast %80 : vector<1x8x128xf32> to vector<8x128xf32>
    %82 = vector.shape_cast %79 : vector<8x128xf32> to vector<1x8x128xf32>
    tpu.vector_store %arg6[%c0_14, %c0_15, %c0_16], %82 {strides = array<i32>} : memref<1x8x128xf32, #tpu.memory_space<vmem>>, vector<1x8x128xf32>,
    return
  }
  func.func @transform_0(%arg0: i32, %arg1: i32) -> (i32, i32, i32) {
    %c0_i32 = arith.constant 0 : i32
    %c0_i32_0 = arith.constant 0 : i32
    return %arg0, %arg1, %c0_i32 : i32, i32, i32
  }
  func.func @transform_1(%arg0: i32, %arg1: i32) -> (i32, i32, i32, i32) {
    %c0_i32 = arith.constant 0 : i32
    %c0_i32_0 = arith.constant 0 : i32
    %c0_i32_1 = arith.constant 0 : i32
    return %arg0, %arg1, %c0_i32, %c0_i32_0 : i32, i32, i32, i32
  }
  func.func @transform_2(%arg0: i32, %arg1: i32) -> (i32, i32, i32) {
    %c0_i32 = arith.constant 0 : i32
    %c0_i32_0 = arith.constant 0 : i32
    %c0_i32_1 = arith.constant 0 : i32
    %c0_i32_2 = arith.constant 0 : i32
    return %c0_i32, %c0_i32_0, %c0_i32_1 : i32, i32, i32
  }
  func.func @transform_3(%arg0: i32, %arg1: i32) -> (i32, i32) {
    %c0_i32 = arith.constant 0 : i32
    %c0_i32_0 = arith.constant 0 : i32
    %c0_i32_1 = arith.constant 0 : i32
    return %c0_i32, %c0_i32_0 : i32, i32
  }
  func.func @transform_4(%arg0: i32, %arg1: i32) -> (i32, i32, i32) {
    %c0_i32 = arith.constant 0 : i32
    %c0_i32_0 = arith.constant 0 : i32
    return %arg0, %arg1, %c0_i32 : i32, i32, i32
  }
}

</mosaic_0001>

<bundles_post_ra>
// kernel: tpu_custom_call.1
= control target key start
LH: loop header
LB: loop body
LE: loop exit
PB: predicated region body
PF: predicated region fallthrough
CT: control target
= control target key end

     0   :  { %s1092_s0 = inlined_call_operand.hbm [shape: f32[2,8,128], index: 0, kind: input, shape index: {}]   ;;  %s1093_s1 = inlined_call_operand.hbm [shape: f32[2,1,2,128], index: 1, kind: input, shape index: {}]   ;;  %s1094_s2 = inlined_call_operand.hbm [shape: f32[3,3,128], index: 2, kind: input, shape index: {}]   ;;  %s1095_s3 = inlined_call_operand.vmem [shape: f32[1,128], index: 3, kind: input, shape index: {}]   ;;  %s1096_s4 = inlined_call_operand.hbm [shape: f32[2,8,128], index: 4, kind: output, shape index: {}]  }
   0x1   :  { %1101 = sst [smem:[#allocation13_spill]] %s1092_s0 }
   0x2   :  { %1102 = sst [smem:[#allocation14_spill]] %s1094_s2 }
   0x3   :  { %9 = vsyncpa [#allocation3], 0 }
   0x4   :  { %11 = vsyncpa [#allocation3 + $0x1], 0 }
   0x5   :  { %12 = vsyncpa [#allocation6], 0 }
   0x6   :  { %14 = vsyncpa [#allocation6 + $0x1], 0 }
   0x7   :  { %15 = vsyncpa [#allocation4], 0 }
   0x8   :  { %17 = vsyncpa [#allocation4 + $0x1], 0  ;;  %s834_s15 = smov 0   ;;  %s836_s16 = smov 0  }
   0x9   :  { %s838_s17 = smov 0   ;;  %s840_s18 = smov 0  }
   0xa   :  { %s842_s19 = smov 0   ;;  %s844_s20 = smov 0  }
   0xb LB: > { %s865_s21 = sadd.s32 4294967295, %s798_s20   ;;  %s519_s22 = sadd.s32 4294967294, %s798_s20   ;;  %s798_s20 = sphi %s844_s20, %s23_s20   ;;  %s794_s19 = sphi %s842_s19, %s1125_s19   ;;  %s790_s18 = sphi %s840_s18, %s1124_s18   ;;  %s786_s17 = sphi %s838_s17, %s1123_s17   ;;  %s782_s16 = sphi %s836_s16, %s1122_s16   ;;  %s778_s15 = sphi %s834_s15, %s1121_s15  }
   0xc   : > { %p57_p0 = scmp.ne.s32.totalorder %s782_s16, %s778_s15  ;;  %p1097_p1 = scmp.eq.s32.totalorder %s865_s21, 0 }
   0xd   : > { %p159_p3 = scmp.eq.s32.totalorder %s519_s22, 1  ;;  %p520_p5 = scmp.ge.s32.totalorder %s798_s20, 1 }
   0xe   : > { %p874_p4 = por %p1097_p1, %p57_p0  ;;  %p166_p7 = scmp.lt.s32.totalorder %s798_s20, 3 }
   0xf   : > { %p879_p6 = por %p159_p3, %p57_p0  ;;  %s800_s26 = smov [#allocation7]  }
  0x10   : > { %s1103_s23 = scalar_select %p874_p4, 1, 0 }
  0x11   : > { %s1104_s24 = scalar_select %p879_p6, 1, 0 }
  0x12   : > { %p884_p8 = pnand %p520_p5, %p166_p7  ;;  %s178_s27 = sshll.u32 %s800_s26, 4  ;;  %s179_s27 = int_to_ptr.vmem [resolvable:$true] %s178_s27 }
  0x13   : > { %s35_s29 = sadd.s32 1, %s794_s19  ;;  %s1107_s2 = sld [smem:[#allocation14_spill]] }
  0x14   : > { %s1105_s25 = scalar_select %p884_p8, 1, 0 }
  0x15   : > { %p547_p9 = pneg %p884_p8 }
  0x17   : > { %p893_p11 = pnand %p547_p9, %p1097_p1 }
  0x19   : > { %s620_s6 = scalar_lea.hbm %s1107_s2, 192  ;;  %p622_p13 = pneg %p893_p11 }
  0x1a   : > { %p621_p12 = scmp.ne.s32.totalorder %s1107_s2, %s620_s6  ;;  %p627_p5 = scmp.lt.u32.totalorder %s620_s6, %s1107_s2 }
  0x1c   : > { %p623_p0 = pnand %p622_p13, %p621_p12 }
  0x1e   : > { %p624_p3 = pneg %p623_p0 }
  0x20   : > { %p629_p7 = pnand %p627_p5, %p624_p3 }
  0x22   : > { %632 = shalt.err (!%p629_p7)
}
  0x23   : > { %s633_s11 = scalar_lea.vmem %s179_s27, 192  ;;  %p641_p2 = scmp.lt.s32.totalorder %s179_s27, %s179_s27 }
  0x24   : > { %p634_p9 = scmp.ne.s32.totalorder %s179_s27, %s633_s11  ;;  %p642_p6 = scmp.lt.s32.totalorder %s633_s11, %s633_s11 }
  0x26   : > { %p636_p10 = pnand %p634_p9, %p622_p13  ;;  %p643_p4 = por %p642_p6, %p641_p2 }
  0x28   : > { %p637_p1 = pneg %p636_p10 }
  0x2a   : > { %p644_p8 = pnand %p643_p4, %p637_p1 }
  0x2c   : > { %647 = shalt.err (!%p644_p8)
}
  0x2d   : > { %s801_s12 = smov 64   ;;  %s802_s13 = smov 4  }
  0x2e   : > { %550 = dma.hbm_to_vmem [thread:$0]  (!%p893_p11), %s1107_s2, 192, %s179_s27, [#allocation6], %s801_s12, %s801_s12, %s802_s13  }
  0x2f   : > { %p37_p1 = scmp.ge.s32.totalorder %s35_s29, 2  ;;  %s44_s26 = sadd.s32 1, %s786_s17 }
  0x30   : > { %p51_p2 = scmp.ne.s32.totalorder %s786_s17, %s782_s16  ;;  %p52_p4 = scmp.eq.s32.totalorder %s798_s20, 0 }
  0x31   : > { %s1127_s29 = smov (%p37_p1, %s35_s29), 0  ;;  %p1109_p8 = scmp.eq.s32.totalorder %s865_s21, 1 }
  0x32   : > { %p920_p6 = por %p52_p4, %p51_p2  ;;  %s39_s5 = ssub.s32 %s794_s19, %s1127_s29 }
  0x33   : > { %p926_p10 = por %p1109_p8, %p51_p2  ;;  %p563_p11 = scmp.lt.s32.totalorder %s798_s20, 2 }
  0x34   : > { %p42_p12 = scmp.eq.s32.totalorder %s39_s5, 0  ;;  %s934_s27 = sand.u32 1, %s786_s17  }
  0x35   : > { %s1110_s28 = scalar_select %p926_p10, 1, 0 }
  0x36   : > { %s523_s6 = sshll.u32 %s934_s27, 3  ;;  %s524_s8 = sshll.u32 %s794_s19, 7 }
  0x37   : > { %s938_s7 = scalar_select %p42_p12, %s786_s17, %s44_s26  }
  0x38   : > { %s1111_s0 = sld [smem:[#allocation13_spill]]  ;;  %s199_s12 = scalar_lea.vmem [#allocation2], %s523_s6 }
  0x39   : > { %s207_s13 = sshll.u32 %s199_s12, 4  ;;  %p950_p13 = pnand %p563_p11, %p920_p6  ;;  %s946_s13 = int_to_ptr.vmem [resolvable:$true] %s207_s13 }
  0x3a   : > { %s525_s26 = sshll.u32 %s934_s27, 1  ;;  %s196_s5 = scalar_lea.sflag [#allocation3], %s934_s27 }
  0x3b   : > { %p650_p3 = pneg %p950_p13 }
  0x3e   : > { %s944_s11 = scalar_lea.hbm %s1111_s0, %s524_s8  ;;  %s653_s30 = scalar_lea.hbm %s1111_s0, 256 }
  0x3f   : > { %s648_s8 = scalar_lea.hbm %s944_s11, 128  ;;  %p654_p9 = scmp.lt.u32.totalorder %s944_s11, %s1111_s0 }
  0x40   : > { %p649_p0 = scmp.ne.s32.totalorder %s944_s11, %s648_s8  ;;  %p655_p1 = scmp.lt.u32.totalorder %s653_s30, %s648_s8 }
  0x41   : > { %p657_p4 = scmp.lt.u32.totalorder %s648_s8, %s944_s11 }
  0x42   : > { %p651_p5 = pnand %p650_p3, %p649_p0  ;;  %p656_p2 = por %p655_p1, %p654_p9 }
  0x44   : > { %p652_p7 = pneg %p651_p5  ;;  %p658_p6 = por %p657_p4, %p656_p2 }
  0x46   : > { %p659_p8 = pnand %p658_p6, %p652_p7 }
  0x48   : > { %662 = shalt.err (!%p659_p8)
}
  0x49   : > { %s663_s22 = scalar_lea.vmem %s946_s13, 128  ;;  %s803_s6 = smov [#allocation2]  }
  0x4a   : > { %p664_p11 = scmp.ne.s32.totalorder %s946_s13, %s663_s22  ;;  %s668_s9 = sshll.u32 %s803_s6, 4  ;;  %s669_s9 = int_to_ptr.vmem [resolvable:$false] %s668_s9 }
  0x4b   : > { %s670_s10 = scalar_lea.vmem %s669_s9, 256  ;;  %p671_p5 = scmp.lt.s32.totalorder %s946_s13, %s669_s9 }
  0x4c   : > { %p666_p12 = pnand %p664_p11, %p650_p3  ;;  %p672_p9 = scmp.lt.s32.totalorder %s670_s10, %s663_s22 }
  0x4e   : > { %p667_p0 = pneg %p666_p12  ;;  %p673_p1 = por %p672_p9, %p671_p5 }
  0x50   : > { %p674_p2 = pnand %p673_p1, %p667_p0 }
  0x52   : > { %677 = shalt.err (!%p674_p2)
}
  0x53   : > { %554 = dma.hbm_to_vmem [thread:$0]  (!%p950_p13), %s944_s11, 128, %s946_s13, %s196_s5  }
  0x54   : > { %s526_s8 = sshll.u32 %s794_s19, 5  ;;  %s218_s22 = scalar_lea.vmem [#allocation5], %s525_s26 }
  0x55   : > { %s986_s6 = scalar_lea.hbm %s1093_s1, %s526_s8  ;;  %s226_s9 = sshll.u32 %s218_s22, 4  ;;  %s227_s9 = int_to_ptr.vmem [resolvable:$true] %s226_s9 }
  0x56   : > { %s1113_s10 = sand.u32 1, %s798_s20   ;;  %s678_s2 = scalar_lea.hbm %s986_s6, 32 }
  0x57   : > { %s215_s0 = scalar_lea.sflag [#allocation6], %s1113_s10  ;;  %p679_p7 = scmp.ne.s32.totalorder %s986_s6, %s678_s2 }
  0x58   : > { %s683_s5 = scalar_lea.hbm %s1093_s1, 64  ;;  %p684_p8 = scmp.lt.u32.totalorder %s986_s6, %s1093_s1 }
  0x59   : > { %p681_p4 = pnand %p679_p7, %p650_p3  ;;  %p685_p11 = scmp.lt.u32.totalorder %s683_s5, %s678_s2 }
  0x5a   : > { %p687_p0 = scmp.lt.u32.totalorder %s678_s2, %s986_s6 }
  0x5b   : > { %p682_p6 = pneg %p681_p4  ;;  %p686_p12 = por %p685_p11, %p684_p8 }
  0x5d   : > { %p688_p5 = por %p687_p0, %p686_p12 }
  0x5f   : > { %p689_p9 = pnand %p688_p5, %p682_p6 }
  0x61   : > { %692 = shalt.err (!%p689_p9)
}
  0x62   : > { %s693_s26 = scalar_lea.vmem %s227_s9, 32  ;;  %s804_s30 = smov [#allocation5]  }
  0x63   : > { %p694_p1 = scmp.ne.s32.totalorder %s227_s9, %s693_s26  ;;  %s698_s12 = sshll.u32 %s804_s30, 4  ;;  %s699_s12 = int_to_ptr.vmem [resolvable:$false] %s698_s12 }
  0x64   : > { %s700_s22 = scalar_lea.vmem %s699_s12, 64  ;;  %p701_p4 = scmp.lt.s32.totalorder %s227_s9, %s699_s12 }
  0x65   : > { %p696_p2 = pnand %p694_p1, %p650_p3  ;;  %p702_p10 = scmp.lt.s32.totalorder %s700_s22, %s693_s26 }
  0x67   : > { %p697_p7 = pneg %p696_p2  ;;  %p703_p8 = por %p702_p10, %p701_p4 }
  0x69   : > { %p704_p11 = pnand %p703_p8, %p697_p7 }
  0x6b   : > { %707 = shalt.err (!%p704_p11)
}
  0x6c   : > { %557 = dma.hbm_to_vmem [thread:$0]  (!%p950_p13), %s986_s6, 32, %s227_s9, %s215_s0  }
  0x6d   : > { %p1114_p6 = scmp.ne.s32.totalorder %s1105_s25, 0 }
  0x6e   : > { %s1014_s2 = sand.u32 (!%p1114_p6), 1, %s782_s16   ;;  %p1115_p10 = scmp.ne.s32.totalorder (!%p1114_p6), %s1103_s23, 0 }
  0x6f   : > { %235 = sbr.rel (%p1114_p6) target bundleno = 389 (0x185), region = 36  ;;  %s528_s10 = sshll.u32 (!%p1114_p6), %s1014_s2, 3 }
  0x70   : > { %s238_s11 = scalar_lea.sflag (!%p1114_p6), [#allocation3], %s1014_s2  ;;  %s241_s13 = scalar_lea.vmem (!%p1114_p6), [#allocation2], %s528_s10 }
  0x76   : > { %761 = dma.done.wait (%p1115_p10), %s238_s11, 128  }
  0x77   : > { %763 = vsyncadd (%p1115_p10), %s238_s11, 4294967168  ;;  %s246_s0 = sand.u32 1, %s865_s21   ;;  %s529_s25 = sshll.u32 %s1014_s2, 1 }
  0x78   : > { %s247_s14 = scalar_lea.sflag [#allocation6], %s246_s0  ;;  %s250_s6 = scalar_lea.vmem [#allocation5], %s529_s25 }
  0x79   : > { %765 = dma.done.wait (%p1115_p10), %s247_s14, 32  }
  0x7a   : > { %767 = vsyncadd (%p1115_p10), %s247_s14, 4294967264  ;;  %p1116_p13 = scmp.eq.s32.totalorder %s865_s21, 0 }
  0x7c   : > { %769 = dma.done.wait (%p1116_p13), [#allocation6], 192   ;;  %p1117_p3 = pmov %p1116_p13 }
  0x7d   : > { %v317_v0 = vlaneseq  ;;  %vm294_vm0 = vcmask 1040384   ;;  %v284_v3 = vld [vmem:[%s241_s13] sm:$0xff]  ;;  %v285_v4 = vld [vmem:[%s250_s6] sm:$0x1]  ;;  %v286_v5 = vld [vmem:[%s250_s6 + $0x1] sm:$0x1] }
  0x7e   : > { %771 = vsyncadd (%p1117_p3), [#allocation6], 4294967104  ;;  %vm301_vm1 = vcmask 1046528   ;;  %v292_v6 = vrot.slane %v284_v3, 7  ;;  %v296_v7 = vrot.slane %v284_v3, 1  ;;  %v299_v8 = vrot.slane %v286_v5, 1 }
  0x7f   : > { %v318_v1 = vshrl.u32 %v317_v0, 7  ;;  %v287_v9 = vld [vmem:[#allocation7] sm:$0x7]  ;;  %v289_v10 = vld [vmem:[#allocation7 + $0x8] sm:$0x7]  ;;  %s805_s21 = smov 64  }
  0x80   : > { %v288_v12 = vld [vmem:[#allocation7 + $0x4] sm:$0x7]  ;;  %v295_v13 = vsel %vm294_vm0, %v285_v4, %v292_v6  ;;  %v302_v14 = vsel %vm301_vm1, %v296_v7, %v299_v8  ;;  %vm310_vm2 = vcmask 523264   ;;  %s806_s23 = smov 4   ;;  %s807_s9 = smov 124   ;;  %vm372_vm3 = vcmask 31744  }
  0x81   : > { %v319_v2 = vsub.s32 1, %v318_v1  ;;  %304 = vrot.lane.b32.xlu0 %v295_v13, %s805_s21  ;;  %313 = vrot.lane.b32.xlu1 %v302_v14, %s805_s21  ;;  %v336_v18 = vsub.s32 0, %v318_v1  ;;  %v353_v19 = vsub.s32 2, %v318_v1  ;;  %vm378_vm4 = vcmask 1014784   ;;  %v532_v45 = vld [vmem:[%s1095_s3] ss:$0 sm:$0xff] }
  0x82   : > { %s534_s8 = sshll.u32 %s790_s18, 7  ;;  %s283_s26 = scalar_lea.vmem [#allocation8], %s528_s10 }
  0x83   : > { %v320_v11 = vrot.slane %v287_v9, %v319_v2  ;;  %v331_v15 = vrot.slane %v289_v10, %v319_v2  ;;  %v325_v16 = vrot.slane %v288_v12, %v319_v2  ;;  %v342_v21 = vrot.slane %v288_v12, %v336_v18  ;;  %s405_s30 = sshll.u32 %s283_s26, 4  ;;  %s1043_s11 = scalar_lea.hbm %s1096_s4, %s534_s8  ;;  %s1045_s30 = int_to_ptr.vmem [resolvable:$true] %s405_s30 }
  0x84   : > { %v359_v22 = vrot.slane %v288_v12, %v353_v19  ;;  %v337_v24 = vrot.slane %v287_v9, %v336_v18  ;;  %v354_v25 = vrot.slane %v287_v9, %v353_v19  ;;  %v348_v26 = vrot.slane %v289_v10, %v336_v18  ;;  %s391_s13 = scalar_lea.sflag [#allocation4], %s1014_s2  ;;  %s708_s0 = scalar_lea.vmem %s1045_s30, 128 }
  0x85   : > { %v326_v17 = vmul.f32 %v325_v16, %v284_v3  ;;  %307 = vrot.lane.b32.xlu0 %v284_v3, %s805_s21  ;;  %v343_v28 = vmul.f32 %v342_v21, %v284_v3  ;;  %v365_v29 = vrot.slane %v289_v10, %v353_v19  ;;  %p709_p12 = scmp.ne.s32.totalorder %s1045_s30, %s708_s0  ;;  %p1118_p0 = scmp.ne.s32.totalorder %s1110_s28, 0 }
  0x86   : > { %v360_v32 = vmul.f32 %v359_v22, %v284_v3  ;;  %s808_s18 = smov [#allocation8]  }
  0x87   : > { %p710_p5 = pnand %p709_p12, %p1118_p0  ;;  %s712_s10 = sshll.u32 %s808_s18, 4  ;;  %s713_s10 = int_to_ptr.vmem [resolvable:$false] %s712_s10 }
  0x88   : > { %s714_s25 = scalar_lea.vmem %s713_s10, 256  ;;  %p715_p1 = scmp.lt.s32.totalorder %s1045_s30, %s713_s10 }
  0x89   : > { %p711_p9 = pneg %p710_p5  ;;  %p716_p2 = scmp.lt.s32.totalorder %s714_s25, %s708_s0 }
  0x8b   : > { %p717_p7 = por %p716_p2, %p715_p1 }
  0x8d   : > { %p718_p4 = pnand %p717_p7, %p711_p9 }
  0xf3   : > { %v305_v20 = vpop.permute.xlu0 %304  ;;  %v314_v23 = vpop.permute.xlu1 %313 }
  0xf7   : > { %v308_v27 = vpop.permute.xlu0 %307 }
  0xf8   : > { %v311_v30 = vsel %vm310_vm2, %v305_v20, %v308_v27  ;;  %v316_v31 = vsel %vm310_vm2, %v308_v27, %v314_v23 }
  0xf9   : > { %v321_v33 = vmul.f32 %v320_v11, %v311_v30  ;;  %v332_v34 = vmul.f32 %v331_v15, %v316_v31  ;;  %v338_v35 = vmul.f32 %v337_v24, %v311_v30  ;;  %v355_v36 = vmul.f32 %v354_v25, %v311_v30 }
  0xfa   : > { %v349_v37 = vmul.f32 %v348_v26, %v316_v31  ;;  %v366_v40 = vmul.f32 %v365_v29, %v316_v31 }
  0xfb   : > { %v344_v38 = vadd.f32 %v343_v28, %v338_v35  ;;  %v327_v39 = vadd.f32 %v326_v17, %v321_v33  ;;  %v361_v41 = vadd.f32 %v360_v32, %v355_v36 }
  0xfd   : > { %v350_v42 = vadd.f32 %v349_v37, %v344_v38  ;;  %v333_v43 = vadd.f32 %v332_v34, %v327_v39  ;;  %v367_v44 = vadd.f32 %v366_v40, %v361_v41 }
  0xff   : > { %369 = vrot.lane.b32.xlu1 %v350_v42, %s806_s23  ;;  %375 = vrot.lane.b32.xlu0 %v367_v44, %s807_s9 }
 0x171   : > { %v370_v46 = vpop.permute.xlu1 %369  ;;  %v376_v47 = vpop.permute.xlu0 %375 }
 0x172   : > { %v373_v48 = vsel %vm372_vm3, 0.0, %v370_v46  ;;  %v379_v49 = vsel %vm378_vm4, %v376_v47, 0.0 }
 0x173   : > { %v380_v50 = vadd.f32 %v373_v48, %v333_v43  ;;  %v387_v51 = vadd.f32 %v532_v45, %v379_v49 }
 0x175   : > { %v388_v52 = vadd.f32 %v387_v51, %v380_v50 }
 0x177   : > { %389 = vst [vmem:[%s283_s26] sm:$0xff] %v388_v52 }
 0x178   : > { %721 = shalt.err (!%p718_p4)
}
 0x179   : > { %s722_s2 = scalar_lea.hbm %s1043_s11, 128  ;;  %s726_s21 = scalar_lea.hbm %s1096_s4, 256 }
 0x17a   : > { %p723_p8 = scmp.ne.s32.totalorder %s1043_s11, %s722_s2  ;;  %p727_p10 = scmp.lt.u32.totalorder %s1043_s11, %s1096_s4 }
 0x17b   : > { %p728_p13 = scmp.lt.u32.totalorder %s726_s21, %s722_s2  ;;  %p730_p12 = scmp.lt.u32.totalorder %s722_s2, %s1043_s11 }
 0x17c   : > { %p724_p11 = pnand %p723_p8, %p1118_p0 }
 0x17d   : > { %p729_p3 = por %p728_p13, %p727_p10 }
 0x17e   : > { %p725_p6 = pneg %p724_p11 }
 0x17f   : > { %p731_p5 = por %p730_p12, %p729_p3 }
 0x181   : > { %p732_p9 = pnand %p731_p5, %p725_p6 }
 0x183   : > { %735 = shalt.err (!%p732_p9)
}
 0x184   : > { %545 = dma.vmem_to_hbm [thread:$0]  (%p1118_p0), %s1045_s30, 128, %s1043_s11, %s391_s13  }
 0x185 PF: > { %s417_s5 = sand.u32 1, %s778_s15   ;;  %p1119_p1 = scmp.ne.s32.totalorder %s1104_s24, 0 }
 0x186   : > { %p1120_p2 = scmp.ge.s32.totalorder %s798_s20, 2  ;;  %s418_s27 = scalar_lea.sflag [#allocation4], %s417_s5 }
 0x188   : > { %p559_p7 = pnand %p1120_p2, %p1119_p1 }
 0x18a   : > { %773 = dma.done.wait (!%p559_p7), %s418_s27, 128  }
 0x18b   : > { %775 = vsyncadd (!%p559_p7), %s418_s27, 4294967168  ;;  %s23_s20 = sadd.s32 1, %s798_s20   ;;  %s1121_s15 = smov %s782_s16 }
 0x18c   : > { %p20_p4 = scmp.ge.s32.totalorder %s23_s20, 4   ;;  %s1122_s16 = smov %s786_s17 }
 0x18d   : > { %s1123_s17 = smov %s938_s7  ;;  %s1124_s18 = smov %s794_s19 }
 0x18e   : > { %s1125_s19 = smov %s1127_s29  ;;  %22 = sbr.rel (!%p20_p4) target bundleno = 11 (0xb), region = 98 }
 0x195   :  { %423 = vsyncpa [#allocation3], 1 }
 0x196   :  { %425 = vsyncpa [#allocation3 + $0x1], 1 }
 0x197   :  { %426 = vsyncpa [#allocation6], 1 }
 0x198   :  { %428 = vsyncpa [#allocation6 + $0x1], 1 }
 0x199   :  { %429 = vsyncpa [#allocation4], 1 }
 0x19a   :  { %431 = vsyncpa [#allocation4 + $0x1], 1 }

</bundles_post_ra>
